<compile_context>
chip_gen: v7x
topology: tpu7x:2x2x1
jax: 0.10.0
libtpu: 0.0.40
codegen_flags: <defaults>
</compile_context>

<pallas_src>
import jax
import jax.numpy as jnp
from jax.experimental import pallas as pl
from jax.experimental.pallas import tpu as pltpu


def _round_up(x, m):
    return (x + m - 1) // m * m


def _vmem_limit_bytes():
    """Per-generation scoped-VMEM budget: ~3/4 of physical VMEM.
    v5e/v6e: 128 MiB -> 96 MiB;  v7x: 64 MiB -> 48 MiB."""
    try:
        cap = int(pltpu.get_tpu_info().vmem_capacity_bytes)
    except Exception:
        cap = 64 * 1024 * 1024  # conservative (v7x-sized) fallback
    return cap * 3 // 4


# ---------------------------------------------------------------------------
# Host-side fold: 1x1 Conv1d (no bias) + BatchNorm1d (eval) + flatten -> w1/b1
# (kept in f32; only the folded result is cast to bf16 afterwards)
# ---------------------------------------------------------------------------
def fold_transition_into_fc(w_conv, gamma, beta, running_mean, running_var,
                            w1, b1, in_dim, eps=1e-5):
    """Returns (w1_eff, b1_eff) acting directly on the *untransformed* flattened x."""
    Ct, C = w_conv.shape
    L = in_dim
    fc = w1.shape[1]
    inv = gamma / jnp.sqrt(running_var + eps)         # (Ct,)
    scale = inv                                       # BN scale
    shift = beta - running_mean * inv                 # BN shift
    w1_r = w1.reshape(Ct, L, fc)                      # w1 rows indexed by (ct, l)
    w_scaled = w_conv * scale[:, None]                # (Ct, C)
    # w1_eff[c*L+l, :] = sum_ct w_scaled[ct, c] * w1[ct*L+l, :]
    w1_eff = jnp.einsum("tc,tlf->clf", w_scaled, w1_r).reshape(C * L, fc)
    b1_eff = b1 + jnp.einsum("t,tlf->f", shift, w1_r)[None, :]
    return w1_eff, b1_eff


# ---------------------------------------------------------------------------
# One-time parameter preparation (fold + pad + bf16 cast).  Cache the result.
# ---------------------------------------------------------------------------
def prepare_fc_params(params, in_dim, eps=1e-5):
    f = params["fc"]
    w1, b1 = f["w1"], f["b1"]
    if params.get("transition") is not None:
        t = params["transition"]
        w1, b1 = fold_transition_into_fc(
            t["w"], t["gamma"], t["beta"], t["running_mean"], t["running_var"],
            w1, b1, in_dim, eps)
    w2, b2, w3, b3 = f["w2"], f["b2"], f["w3"], f["b3"]

    d_in, fc_dim = w1.shape
    num_outputs = w3.shape[1]

    f32, bf16 = jnp.float32, jnp.bfloat16

    vmem_limit = _vmem_limit_bytes()
    budget = int(vmem_limit * 0.8)

    # Lane-dense padding; prefer 256 multiples for fc_dim (2x256x256 MXU on v6e/v7x).
    FCp = _round_up(fc_dim, 256) if fc_dim > 128 else _round_up(fc_dim, 128)
    OUTp = _round_up(num_outputs, 128)

    # Resident bf16 operands (single-buffered when pl.Buffered(1) is available).
    resident_mult = 1 if hasattr(pl, "Buffered") else 2
    resident = resident_mult * 2 * (FCp * FCp + FCp * OUTp) + 4 * (2 * FCp + OUTp)

    # Size tk against the budget assuming a nominal batch tile of 256.
    tm_nom = 256
    fixed = tm_nom * FCp * 4 + 2 * tm_nom * OUTp * 4           # acc f32 + out bufs
    remaining = max(budget - resident - fixed, 0)

    Kp = _round_up(d_in, 128)
    tk = 128
    while tk < Kp and (2 * (2 * tk) * FCp * 2 + 2 * tm_nom * (2 * tk) * 2) <= remaining:
        tk *= 2
    tk = min(tk, Kp)
    Kp = _round_up(Kp, tk)

    # Zero padding is exact: padded K rows/columns contribute 0 through the
    # whole stack; padded outputs are sliced off in the wrapper.
    prepared = {
        "w1p": jnp.zeros((Kp, FCp), bf16).at[:d_in, :fc_dim].set(w1.astype(bf16)),
        "b1p": jnp.zeros((1, FCp), f32).at[:, :fc_dim].set(b1.reshape(1, -1).astype(f32)),
        "w2p": jnp.zeros((FCp, FCp), bf16).at[:fc_dim, :fc_dim].set(w2.astype(bf16)),
        "b2p": jnp.zeros((1, FCp), f32).at[:, :fc_dim].set(b2.reshape(1, -1).astype(f32)),
        "w3p": jnp.zeros((FCp, OUTp), bf16).at[:fc_dim, :num_outputs].set(w3.astype(bf16)),
        "b3p": jnp.zeros((1, OUTp), f32).at[:, :num_outputs].set(b3.reshape(1, -1).astype(f32)),
    }
    meta = dict(d_in=d_in, fc_dim=fc_dim, num_outputs=num_outputs,
                Kp=Kp, FCp=FCp, OUTp=OUTp, tk=tk,
                vmem_limit=vmem_limit, budget=budget, resident=resident)
    return prepared, meta


# ---------------------------------------------------------------------------
# Fused FC stack kernel: K-streamed Linear(1) accumulation, then bias/ReLU,
# Linear(2)/ReLU, Linear(3) on the final K step.  Dropout: eval = identity.
# ---------------------------------------------------------------------------
def _fc_kernel(x_ref, w1_ref, b1_ref, w2_ref, b2_ref, w3_ref, b3_ref,
               o_ref, acc_ref):
    k = pl.program_id(1)

    # Stream w1 over K; f32 accumulation on the MXU.
    part = jnp.dot(x_ref[...], w1_ref[...], preferred_element_type=jnp.float32)

    @pl.when(k == 0)
    def _():
        acc_ref[...] = part            # no zero-init store + reload

    @pl.when(k != 0)
    def _():
        acc_ref[...] = acc_ref[...] + part

    @pl.when(k == pl.num_programs(1) - 1)
    def _():
        # TODO(synk): training-mode dropout masks (PRNG) not implemented (eval only).
        h = jnp.maximum(acc_ref[...] + b1_ref[...], 0.0).astype(w2_ref.dtype)
        h = jnp.dot(h, w2_ref[...], preferred_element_type=jnp.float32) + b2_ref[...]
        h = jnp.maximum(h, 0.0).astype(w3_ref.dtype)
        o_ref[...] = (jnp.dot(h, w3_ref[...], preferred_element_type=jnp.float32)
                      + b3_ref[...]).astype(o_ref.dtype)


def fc_forward(x_flat, prepared, meta, *, tm_cap=512):
    B = x_flat.shape[0]
    d_in = meta["d_in"]
    fc_dim, num_outputs = meta["fc_dim"], meta["num_outputs"]
    Kp, FCp, OUTp, tk = meta["Kp"], meta["FCp"], meta["OUTp"], meta["tk"]
    f32, bf16 = jnp.float32, jnp.bfloat16

    # Batch tile: prefer ONE big tile (w1 is re-streamed from HBM once per batch
    # tile), rounded to 16 for clean packed-bf16 (16,128) tiles.
    tm = min(_round_up(B, 16), tm_cap)
    remaining = meta["budget"] - meta["resident"] - 2 * tk * FCp * 2
    while tm > 16 and (tm * FCp * 4 + 2 * tm * OUTp * 4 + 2 * tm * tk * 2) > remaining:
        tm = max(16, _round_up(tm // 2, 16))
    Bp = _round_up(B, tm)
    nm, nk = Bp // tm, Kp // tk

    xp = jnp.zeros((Bp, Kp), bf16).at[:B, :d_in].set(x_flat.astype(bf16))

    flops = 2 * B * (d_in * fc_dim + fc_dim * fc_dim + fc_dim * num_outputs)
    bytes_accessed = (
        xp.size * 2                          # x read once
        + nm * Kp * FCp * 2                  # w1 re-streamed once per batch tile
        + (FCp * FCp + FCp * OUTp) * 2       # resident w2/w3 read once
        + (2 * FCp + OUTp) * 4               # biases
        + Bp * OUTp * 4                      # output write
    )

    # TODO(synk): on v7x with nm == 1 the "parallel" batch axis gives the second
    # TensorCore nothing; splitting the K reduction across cores would ~2x the
    # dominant w1-streaming phase.
    # TODO(synk): for very large fc_dim (>= 4096) on v7x, tile the epilogue's N
    # dimension (stream w2/w3 column blocks) instead of holding them resident.

    def run(single_buffer):
        def resident_spec(shape):
            if single_buffer:
                return pl.BlockSpec(shape, lambda i, k: (0, 0),
                                    pipeline_mode=pl.Buffered(1))
            return pl.BlockSpec(shape, lambda i, k: (0, 0))

        out = pl.pallas_call(
            _fc_kernel,
            out_shape=jax.ShapeDtypeStruct((Bp, OUTp), f32),
            grid_spec=pltpu.PrefetchScalarGridSpec(
                num_scalar_prefetch=0,
                grid=(nm, nk),                                     # reduction axis last
                in_specs=[
                    pl.BlockSpec((tm, tk), lambda i, k: (i, k)),   # x tile
                    pl.BlockSpec((tk, FCp), lambda i, k: (k, 0)),  # w1 tile (streamed)
                    resident_spec((1, FCp)),                       # b1
                    resident_spec((FCp, FCp)),                     # w2
                    resident_spec((1, FCp)),                       # b2
                    resident_spec((FCp, OUTp)),                    # w3
                    resident_spec((1, OUTp)),                      # b3
                ],
                out_specs=pl.BlockSpec((tm, OUTp), lambda i, k: (i, 0)),
                scratch_shapes=[pltpu.VMEM((tm, FCp), f32)],       # f32 accumulator
            ),
            compiler_params=pltpu.CompilerParams(
                dimension_semantics=("parallel", "arbitrary"),
                vmem_limit_bytes=int(meta["vmem_limit"]),
            ),
            cost_estimate=pl.CostEstimate(
                flops=int(flops), transcendentals=0,
                bytes_accessed=int(bytes_accessed)),
        )(xp, prepared["w1p"], prepared["b1p"], prepared["w2p"],
          prepared["b2p"], prepared["w3p"], prepared["b3p"])
        return jax.block_until_ready(out)

    if hasattr(pl, "Buffered"):
        try:
            out = run(True)
        except Exception:
            out = run(False)     # fall back to default double-buffered residents
    else:
        out = run(False)

    return out[:B, :num_outputs]


# ---------------------------------------------------------------------------
# Module wrapper
# ---------------------------------------------------------------------------
def fc_output_module_forward(x, prepared, meta):
    B = x.shape[0]
    x_flat = x.reshape(B, -1)   # == torch x.view(x.size(0), -1) (row-major)
    return fc_forward(x_flat, prepared, meta)


def init_params(key, in_planes, num_outputs, fc_dim, in_dim, trans_planes=None):
    keys = jax.random.split(key, 12)

    def lin(kw, kb, fan_in, fan_out):
        bound = 1.0 / jnp.sqrt(fan_in)
        # stored as (in, out) so the kernel computes x @ W (== torch x @ W.T)
        w = jax.random.uniform(kw, (fan_in, fan_out), jnp.float32, -bound, bound)
        b = jax.random.uniform(kb, (1, fan_out), jnp.float32, -bound, bound)
        return w, b

    params = {"transition": None}
    fc_in_planes = in_planes
    if trans_planes is not None:
        w_conv = jax.random.normal(keys[0], (trans_planes, in_planes), jnp.float32) * 0.1
        params["transition"] = {
            "w": w_conv,
            "gamma": jax.random.uniform(keys[1], (trans_planes,), jnp.float32, 0.5, 1.5),
            "beta": jax.random.normal(keys[2], (trans_planes,), jnp.float32) * 0.1,
            "running_mean": jax.random.normal(keys[10], (trans_planes,), jnp.float32) * 0.1,
            "running_var": jax.random.uniform(keys[11], (trans_planes,), jnp.float32, 0.5, 1.5),
        }
        fc_in_planes = trans_planes

    d_in = fc_in_planes * in_dim
    w1, b1 = lin(keys[3], keys[4], d_in, fc_dim)
    w2, b2 = lin(keys[5], keys[6], fc_dim, fc_dim)
    w3, b3 = lin(keys[7], keys[8], fc_dim, num_outputs)
    params["fc"] = {"w1": w1, "b1": b1, "w2": w2, "b2": b2, "w3": w3, "b3": b3}
    return params


def _reference_forward(x, params, eps=1e-5):
    """Pure-JAX f32 reference matching the PyTorch module (eval mode)."""
    if params["transition"] is not None:
        t = params["transition"]
        inv = t["gamma"] / jnp.sqrt(t["running_var"] + eps)
        y = jnp.einsum("tc,bcl->btl", t["w"], x)
        x = y * inv[None, :, None] + (t["beta"] - t["running_mean"] * inv)[None, :, None]
    f = params["fc"]
    h = x.reshape(x.shape[0], -1)
    h = jnp.maximum(h @ f["w1"] + f["b1"], 0.0)
    h = jnp.maximum(h @ f["w2"] + f["b2"], 0.0)
    return h @ f["w3"] + f["b3"]


if __name__ == "__main__":
    # Small shapes consistent with the module's forward.
    B, in_planes, in_dim = 2, 4, 8
    trans_planes, fc_dim, num_outputs = 8, 32, 8

    key = jax.random.PRNGKey(0)
    kx, kp = jax.random.split(key)
    x = jax.random.normal(kx, (B, in_planes, in_dim), jnp.float32)

    params = init_params(
        kp, in_planes, num_outputs, fc_dim=fc_dim, in_dim=in_dim,
        trans_planes=trans_planes,
    )

    # Fold + pad + bf16-cast weights ONCE (cached); the forward reuses them.
    prepared, meta = prepare_fc_params(params, in_dim)
    jax.block_until_ready(prepared)

    y = fc_output_module_forward(x, prepared, meta)
    jax.block_until_ready(y)
    assert y.shape == (B, num_outputs), y.shape

    # Second call reuses the cached prepared params (no weight re-prep).
    y2 = fc_output_module_forward(x, prepared, meta)
    jax.block_until_ready(y2)

    # Loose sanity check vs f32 reference (kernel uses bf16 weights/activations).
    y_ref = _reference_forward(x, params)
    err = jnp.max(jnp.abs(y - y_ref)) / (jnp.max(jnp.abs(y_ref)) + 1e-6)
    assert float(err) < 0.15, f"relative error too large: {float(err)}"

    print("KERNEL_OK")
</pallas_src>

<mosaic_0001>
module attributes {stable_mosaic.version = 11 : i64} {
  func.func @_fc_kernel(%arg0: i32, %arg1: i32, %arg2: memref<16x128xbf16, #tpu.memory_space<vmem>>, %arg3: memref<128x128xbf16, #tpu.memory_space<vmem>>, %arg4: memref<1x128xf32, #tpu.memory_space<vmem>>, %arg5: memref<128x128xbf16, #tpu.memory_space<vmem>>, %arg6: memref<1x128xf32, #tpu.memory_space<vmem>>, %arg7: memref<128x128xbf16, #tpu.memory_space<vmem>>, %arg8: memref<1x128xf32, #tpu.memory_space<vmem>>, %arg9: memref<16x128xf32, #tpu.memory_space<vmem>>, %arg10: memref<16x128xf32, #tpu.memory_space<vmem>>) attributes {dimension_semantics = [#tpu.dimension_semantics<parallel>, #tpu.dimension_semantics<arbitrary>], iteration_bounds = array<i64: 1, 1>, scalar_prefetch = 0 : i64, scratch_operands = 1 : i64, tpu.core_type = #tpu.core_type<tc>, window_params = [{transform_indices = @transform_0, window_bounds = array<i64: 16, 128>}, {transform_indices = @transform_1, window_bounds = array<i64: 128, 128>}, {pipeline_mode = #tpu.pipeline_mode<synchronous>, transform_indices = @transform_2, window_bounds = array<i64: 1, 128>}, {pipeline_mode = #tpu.pipeline_mode<synchronous>, transform_indices = @transform_3, window_bounds = array<i64: 128, 128>}, {pipeline_mode = #tpu.pipeline_mode<synchronous>, transform_indices = @transform_4, window_bounds = array<i64: 1, 128>}, {pipeline_mode = #tpu.pipeline_mode<synchronous>, transform_indices = @transform_5, window_bounds = array<i64: 128, 128>}, {pipeline_mode = #tpu.pipeline_mode<synchronous>, transform_indices = @transform_6, window_bounds = array<i64: 1, 128>}, {transform_indices = @transform_7, window_bounds = array<i64: 16, 128>}]} {
    %c0 = arith.constant 0 : index
    %c0_0 = arith.constant 0 : index
    %0 = vector.load %arg2[%c0, %c0_0] : memref<16x128xbf16, #tpu.memory_space<vmem>>, vector<16x128xbf16>
    %c0_1 = arith.constant 0 : index
    %c0_2 = arith.constant 0 : index
    %1 = vector.load %arg3[%c0_1, %c0_2] : memref<128x128xbf16, #tpu.memory_space<vmem>>, vector<128x128xbf16>
    %cst = arith.constant dense<0.000000e+00> : vector<16x128xf32>
    %2 = tpu.matmul %0, %1, %cst {dimension_numbers = #tpu.dot_dimension_numbers<[1], [0], [0], [1], [0, 0, 1, 1], [], []>} : vector<16x128xbf16>, vector<128x128xbf16>, vector<16x128xf32> -> vector<16x128xf32>
    %c0_i32 = arith.constant 0 : i32
    %3 = arith.cmpi eq, %arg1, %c0_i32 : i32
    %4 = arith.extui %3 : i1 to i32
    %c0_i32_3 = arith.constant 0 : i32
    %5 = arith.cmpi ne, %4, %c0_i32_3 : i32
    scf.if %5 {
      %c0_8 = arith.constant 0 : index
      %c0_9 = arith.constant 0 : index
      %12 = vector.load %arg10[%c0_8, %c0_9] : memref<16x128xf32, #tpu.memory_space<vmem>>, vector<16x128xf32>
      tpu.vector_store %arg10[%c0_8, %c0_9], %2 {strides = array<i32>} : memref<16x128xf32, #tpu.memory_space<vmem>>, vector<16x128xf32>,
    } else {
    }
    %c0_i32_4 = arith.constant 0 : i32
    %6 = arith.cmpi ne, %arg1, %c0_i32_4 : i32
    %7 = arith.extui %6 : i1 to i32
    %c0_i32_5 = arith.constant 0 : i32
    %8 = arith.cmpi ne, %7, %c0_i32_5 : i32
    scf.if %8 {
      %c0_8 = arith.constant 0 : index
      %c0_9 = arith.constant 0 : index
      %12 = vector.load %arg10[%c0_8, %c0_9] : memref<16x128xf32, #tpu.memory_space<vmem>>, vector<16x128xf32>
      %13 = arith.addf %12, %2 : vector<16x128xf32>
      %c0_10 = arith.constant 0 : index
      %c0_11 = arith.constant 0 : index
      %14 = vector.load %arg10[%c0_10, %c0_11] : memref<16x128xf32, #tpu.memory_space<vmem>>, vector<16x128xf32>
      tpu.vector_store %arg10[%c0_10, %c0_11], %13 {strides = array<i32>} : memref<16x128xf32, #tpu.memory_space<vmem>>, vector<16x128xf32>,
    } else {
    }
    %c0_i32_6 = arith.constant 0 : i32
    %9 = arith.cmpi eq, %arg1, %c0_i32_6 : i32
    %10 = arith.extui %9 : i1 to i32
    %c0_i32_7 = arith.constant 0 : i32
    %11 = arith.cmpi ne, %10, %c0_i32_7 : i32
    scf.if %11 {
      %c0_8 = arith.constant 0 : index
      %c0_9 = arith.constant 0 : index
      %12 = vector.load %arg10[%c0_8, %c0_9] : memref<16x128xf32, #tpu.memory_space<vmem>>, vector<16x128xf32>
      %c0_10 = arith.constant 0 : index
      %c0_11 = arith.constant 0 : index
      %13 = vector.load %arg4[%c0_10, %c0_11] : memref<1x128xf32, #tpu.memory_space<vmem>>, vector<1x128xf32>
      %14 = vector.broadcast %13 : vector<1x128xf32> to vector<16x128xf32>
      %15 = arith.addf %12, %14 : vector<16x128xf32>
      %cst_12 = arith.constant 0.000000e+00 : f32
      %16 = vector.broadcast %cst_12 : f32 to vector<16x128xf32>
      %17 = arith.maximumf %15, %16 : vector<16x128xf32>
      %18 = arith.truncf %17 : vector<16x128xf32> to vector<16x128xbf16>
      %c0_13 = arith.constant 0 : index
      %c0_14 = arith.constant 0 : index
      %19 = vector.load %arg5[%c0_13, %c0_14] : memref<128x128xbf16, #tpu.memory_space<vmem>>, vector<128x128xbf16>
      %cst_15 = arith.constant dense<0.000000e+00> : vector<16x128xf32>
      %20 = tpu.matmul %18, %19, %cst_15 {dimension_numbers = #tpu.dot_dimension_numbers<[1], [0], [0], [1], [0, 0, 1, 1], [], []>} : vector<16x128xbf16>, vector<128x128xbf16>, vector<16x128xf32> -> vector<16x128xf32>
      %c0_16 = arith.constant 0 : index
      %c0_17 = arith.constant 0 : index
      %21 = vector.load %arg6[%c0_16, %c0_17] : memref<1x128xf32, #tpu.memory_space<vmem>>, vector<1x128xf32>
      %22 = vector.broadcast %21 : vector<1x128xf32> to vector<16x128xf32>
      %23 = arith.addf %20, %22 : vector<16x128xf32>
      %cst_18 = arith.constant 0.000000e+00 : f32
      %24 = vector.broadcast %cst_18 : f32 to vector<16x128xf32>
      %25 = arith.maximumf %23, %24 : vector<16x128xf32>
      %26 = arith.truncf %25 : vector<16x128xf32> to vector<16x128xbf16>
      %c0_19 = arith.constant 0 : index
      %c0_20 = arith.constant 0 : index
      %27 = vector.load %arg7[%c0_19, %c0_20] : memref<128x128xbf16, #tpu.memory_space<vmem>>, vector<128x128xbf16>
      %cst_21 = arith.constant dense<0.000000e+00> : vector<16x128xf32>
      %28 = tpu.matmul %26, %27, %cst_21 {dimension_numbers = #tpu.dot_dimension_numbers<[1], [0], [0], [1], [0, 0, 1, 1], [], []>} : vector<16x128xbf16>, vector<128x128xbf16>, vector<16x128xf32> -> vector<16x128xf32>
      %c0_22 = arith.constant 0 : index
      %c0_23 = arith.constant 0 : index
      %29 = vector.load %arg8[%c0_22, %c0_23] : memref<1x128xf32, #tpu.memory_space<vmem>>, vector<1x128xf32>
      %30 = vector.broadcast %29 : vector<1x128xf32> to vector<16x128xf32>
      %31 = arith.addf %28, %30 : vector<16x128xf32>
      %c0_24 = arith.constant 0 : index
      %c0_25 = arith.constant 0 : index
      %32 = vector.load %arg9[%c0_24, %c0_25] : memref<16x128xf32, #tpu.memory_space<vmem>>, vector<16x128xf32>
      tpu.vector_store %arg9[%c0_24, %c0_25], %31 {strides = array<i32>} : memref<16x128xf32, #tpu.memory_space<vmem>>, vector<16x128xf32>,
    } else {
    }
    return
  }
  func.func @transform_0(%arg0: i32, %arg1: i32) -> (i32, i32) {
    %c0_i32 = arith.constant 0 : i32
    return %arg0, %arg1 : i32, i32
  }
  func.func @transform_1(%arg0: i32, %arg1: i32) -> (i32, i32) {
    %c0_i32 = arith.constant 0 : i32
    %c0_i32_0 = arith.constant 0 : i32
    return %arg1, %c0_i32 : i32, i32
  }
  func.func @transform_2(%arg0: i32, %arg1: i32) -> (i32, i32) {
    %c0_i32 = arith.constant 0 : i32
    %c0_i32_0 = arith.constant 0 : i32
    %c0_i32_1 = arith.constant 0 : i32
    return %c0_i32, %c0_i32_0 : i32, i32
  }
  func.func @transform_3(%arg0: i32, %arg1: i32) -> (i32, i32) {
    %c0_i32 = arith.constant 0 : i32
    %c0_i32_0 = arith.constant 0 : i32
    %c0_i32_1 = arith.constant 0 : i32
    return %c0_i32, %c0_i32_0 : i32, i32
  }
  func.func @transform_4(%arg0: i32, %arg1: i32) -> (i32, i32) {
    %c0_i32 = arith.constant 0 : i32
    %c0_i32_0 = arith.constant 0 : i32
    %c0_i32_1 = arith.constant 0 : i32
    return %c0_i32, %c0_i32_0 : i32, i32
  }
  func.func @transform_5(%arg0: i32, %arg1: i32) -> (i32, i32) {
    %c0_i32 = arith.constant 0 : i32
    %c0_i32_0 = arith.constant 0 : i32
    %c0_i32_1 = arith.constant 0 : i32
    return %c0_i32, %c0_i32_0 : i32, i32
  }
  func.func @transform_6(%arg0: i32, %arg1: i32) -> (i32, i32) {
    %c0_i32 = arith.constant 0 : i32
    %c0_i32_0 = arith.constant 0 : i32
    %c0_i32_1 = arith.constant 0 : i32
    return %c0_i32, %c0_i32_0 : i32, i32
  }
  func.func @transform_7(%arg0: i32, %arg1: i32) -> (i32, i32) {
    %c0_i32 = arith.constant 0 : i32
    %c0_i32_0 = arith.constant 0 : i32
    return %arg0, %c0_i32 : i32, i32
  }
}

module attributes {stable_mosaic.version = 11 : i64} {
  func.func @_fc_kernel(%arg0: i32, %arg1: i32, %arg2: memref<16x128xbf16, #tpu.memory_space<vmem>>, %arg3: memref<128x128xbf16, #tpu.memory_space<vmem>>, %arg4: memref<1x128xf32, #tpu.memory_space<vmem>>, %arg5: memref<128x128xbf16, #tpu.memory_space<vmem>>, %arg6: memref<1x128xf32, #tpu.memory_space<vmem>>, %arg7: memref<128x128xbf16, #tpu.memory_space<vmem>>, %arg8: memref<1x128xf32, #tpu.memory_space<vmem>>, %arg9: memref<16x128xf32, #tpu.memory_space<vmem>>, %arg10: memref<16x128xf32, #tpu.memory_space<vmem>>) attributes {dimension_semantics = [#tpu.dimension_semantics<parallel>, #tpu.dimension_semantics<arbitrary>], iteration_bounds = array<i64: 1, 1>, scalar_prefetch = 0 : i64, scratch_operands = 1 : i64, tpu.core_type = #tpu.core_type<tc>, window_params = [{transform_indices = @transform_0, window_bounds = array<i64: 16, 128>}, {transform_indices = @transform_1, window_bounds = array<i64: 128, 128>}, {pipeline_mode = #tpu.pipeline_mode<synchronous>, transform_indices = @transform_2, window_bounds = array<i64: 1, 128>}, {pipeline_mode = #tpu.pipeline_mode<synchronous>, transform_indices = @transform_3, window_bounds = array<i64: 128, 128>}, {pipeline_mode = #tpu.pipeline_mode<synchronous>, transform_indices = @transform_4, window_bounds = array<i64: 1, 128>}, {pipeline_mode = #tpu.pipeline_mode<synchronous>, transform_indices = @transform_5, window_bounds = array<i64: 128, 128>}, {pipeline_mode = #tpu.pipeline_mode<synchronous>, transform_indices = @transform_6, window_bounds = array<i64: 1, 128>}, {transform_indices = @transform_7, window_bounds = array<i64: 16, 128>}]} {
    %c0 = arith.constant 0 : index
    %c0_0 = arith.constant 0 : index
    %0 = vector.load %arg2[%c0, %c0_0] : memref<16x128xbf16, #tpu.memory_space<vmem>>, vector<16x128xbf16>
    %c0_1 = arith.constant 0 : index
    %c0_2 = arith.constant 0 : index
    %1 = vector.load %arg3[%c0_1, %c0_2] : memref<128x128xbf16, #tpu.memory_space<vmem>>, vector<128x128xbf16>
    %cst = arith.constant dense<0.000000e+00> : vector<16x128xf32>
    %2 = tpu.matmul %0, %1, %cst {dimension_numbers = #tpu.dot_dimension_numbers<[1], [0], [0], [1], [0, 0, 1, 1], [], []>} : vector<16x128xbf16>, vector<128x128xbf16>, vector<16x128xf32> -> vector<16x128xf32>
    %c0_i32 = arith.constant 0 : i32
    %3 = arith.cmpi eq, %arg1, %c0_i32 : i32
    %4 = arith.extui %3 : i1 to i32
    %c0_i32_3 = arith.constant 0 : i32
    %5 = arith.cmpi ne, %4, %c0_i32_3 : i32
    scf.if %5 {
      %c0_8 = arith.constant 0 : index
      %c0_9 = arith.constant 0 : index
      %12 = vector.load %arg10[%c0_8, %c0_9] : memref<16x128xf32, #tpu.memory_space<vmem>>, vector<16x128xf32>
      tpu.vector_store %arg10[%c0_8, %c0_9], %2 {strides = array<i32>} : memref<16x128xf32, #tpu.memory_space<vmem>>, vector<16x128xf32>,
    } else {
    }
    %c0_i32_4 = arith.constant 0 : i32
    %6 = arith.cmpi ne, %arg1, %c0_i32_4 : i32
    %7 = arith.extui %6 : i1 to i32
    %c0_i32_5 = arith.constant 0 : i32
    %8 = arith.cmpi ne, %7, %c0_i32_5 : i32
    scf.if %8 {
      %c0_8 = arith.constant 0 : index
      %c0_9 = arith.constant 0 : index
      %12 = vector.load %arg10[%c0_8, %c0_9] : memref<16x128xf32, #tpu.memory_space<vmem>>, vector<16x128xf32>
      %13 = arith.addf %12, %2 : vector<16x128xf32>
      %c0_10 = arith.constant 0 : index
      %c0_11 = arith.constant 0 : index
      %14 = vector.load %arg10[%c0_10, %c0_11] : memref<16x128xf32, #tpu.memory_space<vmem>>, vector<16x128xf32>
      tpu.vector_store %arg10[%c0_10, %c0_11], %13 {strides = array<i32>} : memref<16x128xf32, #tpu.memory_space<vmem>>, vector<16x128xf32>,
    } else {
    }
    %c0_i32_6 = arith.constant 0 : i32
    %9 = arith.cmpi eq, %arg1, %c0_i32_6 : i32
    %10 = arith.extui %9 : i1 to i32
    %c0_i32_7 = arith.constant 0 : i32
    %11 = arith.cmpi ne, %10, %c0_i32_7 : i32
    scf.if %11 {
      %c0_8 = arith.constant 0 : index
      %c0_9 = arith.constant 0 : index
      %12 = vector.load %arg10[%c0_8, %c0_9] : memref<16x128xf32, #tpu.memory_space<vmem>>, vector<16x128xf32>
      %c0_10 = arith.constant 0 : index
      %c0_11 = arith.constant 0 : index
      %13 = vector.load %arg4[%c0_10, %c0_11] : memref<1x128xf32, #tpu.memory_space<vmem>>, vector<1x128xf32>
      %14 = vector.broadcast %13 : vector<1x128xf32> to vector<16x128xf32>
      %15 = arith.addf %12, %14 : vector<16x128xf32>
      %cst_12 = arith.constant 0.000000e+00 : f32
      %16 = vector.broadcast %cst_12 : f32 to vector<16x128xf32>
      %17 = arith.maximumf %15, %16 : vector<16x128xf32>
      %18 = arith.truncf %17 : vector<16x128xf32> to vector<16x128xbf16>
      %c0_13 = arith.constant 0 : index
      %c0_14 = arith.constant 0 : index
      %19 = vector.load %arg5[%c0_13, %c0_14] : memref<128x128xbf16, #tpu.memory_space<vmem>>, vector<128x128xbf16>
      %cst_15 = arith.constant dense<0.000000e+00> : vector<16x128xf32>
      %20 = tpu.matmul %18, %19, %cst_15 {dimension_numbers = #tpu.dot_dimension_numbers<[1], [0], [0], [1], [0, 0, 1, 1], [], []>} : vector<16x128xbf16>, vector<128x128xbf16>, vector<16x128xf32> -> vector<16x128xf32>
      %c0_16 = arith.constant 0 : index
      %c0_17 = arith.constant 0 : index
      %21 = vector.load %arg6[%c0_16, %c0_17] : memref<1x128xf32, #tpu.memory_space<vmem>>, vector<1x128xf32>
      %22 = vector.broadcast %21 : vector<1x128xf32> to vector<16x128xf32>
      %23 = arith.addf %20, %22 : vector<16x128xf32>
      %cst_18 = arith.constant 0.000000e+00 : f32
      %24 = vector.broadcast %cst_18 : f32 to vector<16x128xf32>
      %25 = arith.maximumf %23, %24 : vector<16x128xf32>
      %26 = arith.truncf %25 : vector<16x128xf32> to vector<16x128xbf16>
      %c0_19 = arith.constant 0 : index
      %c0_20 = arith.constant 0 : index
      %27 = vector.load %arg7[%c0_19, %c0_20] : memref<128x128xbf16, #tpu.memory_space<vmem>>, vector<128x128xbf16>
      %cst_21 = arith.constant dense<0.000000e+00> : vector<16x128xf32>
      %28 = tpu.matmul %26, %27, %cst_21 {dimension_numbers = #tpu.dot_dimension_numbers<[1], [0], [0], [1], [0, 0, 1, 1], [], []>} : vector<16x128xbf16>, vector<128x128xbf16>, vector<16x128xf32> -> vector<16x128xf32>
      %c0_22 = arith.constant 0 : index
      %c0_23 = arith.constant 0 : index
      %29 = vector.load %arg8[%c0_22, %c0_23] : memref<1x128xf32, #tpu.memory_space<vmem>>, vector<1x128xf32>
      %30 = vector.broadcast %29 : vector<1x128xf32> to vector<16x128xf32>
      %31 = arith.addf %28, %30 : vector<16x128xf32>
      %c0_24 = arith.constant 0 : index
      %c0_25 = arith.constant 0 : index
      %32 = vector.load %arg9[%c0_24, %c0_25] : memref<16x128xf32, #tpu.memory_space<vmem>>, vector<16x128xf32>
      tpu.vector_store %arg9[%c0_24, %c0_25], %31 {strides = array<i32>} : memref<16x128xf32, #tpu.memory_space<vmem>>, vector<16x128xf32>,
    } else {
    }
    return
  }
  func.func @transform_0(%arg0: i32, %arg1: i32) -> (i32, i32) {
    %c0_i32 = arith.constant 0 : i32
    return %arg0, %arg1 : i32, i32
  }
  func.func @transform_1(%arg0: i32, %arg1: i32) -> (i32, i32) {
    %c0_i32 = arith.constant 0 : i32
    %c0_i32_0 = arith.constant 0 : i32
    return %arg1, %c0_i32 : i32, i32
  }
  func.func @transform_2(%arg0: i32, %arg1: i32) -> (i32, i32) {
    %c0_i32 = arith.constant 0 : i32
    %c0_i32_0 = arith.constant 0 : i32
    %c0_i32_1 = arith.constant 0 : i32
    return %c0_i32, %c0_i32_0 : i32, i32
  }
  func.func @transform_3(%arg0: i32, %arg1: i32) -> (i32, i32) {
    %c0_i32 = arith.constant 0 : i32
    %c0_i32_0 = arith.constant 0 : i32
    %c0_i32_1 = arith.constant 0 : i32
    return %c0_i32, %c0_i32_0 : i32, i32
  }
  func.func @transform_4(%arg0: i32, %arg1: i32) -> (i32, i32) {
    %c0_i32 = arith.constant 0 : i32
    %c0_i32_0 = arith.constant 0 : i32
    %c0_i32_1 = arith.constant 0 : i32
    return %c0_i32, %c0_i32_0 : i32, i32
  }
  func.func @transform_5(%arg0: i32, %arg1: i32) -> (i32, i32) {
    %c0_i32 = arith.constant 0 : i32
    %c0_i32_0 = arith.constant 0 : i32
    %c0_i32_1 = arith.constant 0 : i32
    return %c0_i32, %c0_i32_0 : i32, i32
  }
  func.func @transform_6(%arg0: i32, %arg1: i32) -> (i32, i32) {
    %c0_i32 = arith.constant 0 : i32
    %c0_i32_0 = arith.constant 0 : i32
    %c0_i32_1 = arith.constant 0 : i32
    return %c0_i32, %c0_i32_0 : i32, i32
  }
  func.func @transform_7(%arg0: i32, %arg1: i32) -> (i32, i32) {
    %c0_i32 = arith.constant 0 : i32
    %c0_i32_0 = arith.constant 0 : i32
    return %arg0, %c0_i32 : i32, i32
  }
}

</mosaic_0001>

<bundles_post_ra>
// kernel: tpu_custom_call.1
= control target key start
LH: loop header
LB: loop body
LE: loop exit
PB: predicated region body
PF: predicated region fallthrough
CT: control target
= control target key end

     0   :  { %12 = vsyncpa [#allocation4], 0  ;;  %s922_s0 = inlined_call_operand.hbm [shape: bf16[16,128], index: 0, kind: input, shape index: {}]   ;;  %s923_s1 = inlined_call_operand.hbm [shape: bf16[128,128], index: 1, kind: input, shape index: {}]   ;;  %s924_s2 = inlined_call_operand.vmem [shape: f32[1,128], index: 2, kind: input, shape index: {}]   ;;  %s925_s3 = inlined_call_operand.hbm [shape: bf16[128,128], index: 3, kind: input, shape index: {}]   ;;  %s926_s4 = inlined_call_operand.vmem [shape: f32[1,128], index: 4, kind: input, shape index: {}]   ;;  %s927_s5 = inlined_call_operand.hbm [shape: bf16[128,128], index: 5, kind: input, shape index: {}]   ;;  %s928_s6 = inlined_call_operand.vmem [shape: f32[1,128], index: 6, kind: input, shape index: {}]   ;;  %s929_s7 = inlined_call_operand.hbm [shape: f32[16,128], index: 7, kind: output, shape index: {}]  }
   0x1   :  { %13 = vsyncpa [#allocation7], 0 }
   0x2   :  { %14 = vsyncpa [#allocation10], 0 }
   0x3   :  { %15 = vsyncpa [#allocation5], 0  ;;  %s746_s24 = smov [#allocation6]   ;;  %s747_s26 = smov [#allocation3]  }
   0x4   :  { %s33_s25 = sshll.u32 %s746_s24, 4  ;;  %s21_s27 = sshll.u32 %s747_s26, 4  ;;  %s34_s25 = int_to_ptr.vmem [resolvable:$true] %s33_s25  ;;  %s797_s27 = int_to_ptr.vmem [resolvable:$true] %s21_s27 }
   0x5   :  { %s628_s30 = scalar_lea.hbm %s923_s1, 1024 }
   0x6   :  { %p629_p0 = scmp.ne.s32.totalorder %s923_s1, %s628_s30  ;;  %p632_p1 = scmp.lt.u32.totalorder %s628_s30, %s923_s1 }
   0x8   :  { %p634_p2 = pnand %p632_p1, %p629_p0 }
   0xa   :  { %637 = shalt.err (!%p634_p2)
}
   0xb   :  { %s638_s12 = scalar_lea.vmem %s34_s25, 1024  ;;  %p643_p4 = scmp.lt.s32.totalorder %s34_s25, %s34_s25 }
   0xc   :  { %p639_p3 = scmp.ne.s32.totalorder %s34_s25, %s638_s12  ;;  %p644_p5 = scmp.lt.s32.totalorder %s638_s12, %s638_s12 }
   0xe   :  { %p645_p6 = por %p644_p5, %p643_p4 }
  0x10   :  { %p646_p7 = pnand %p645_p6, %p639_p3 }
  0x12   :  { %649 = shalt.err (!%p646_p7)
}
  0x13   :  { %s748_s13 = smov 64   ;;  %s749_s14 = smov 4  }
  0x14   :  { %39 = dma.hbm_to_vmem [thread:$0]  %s923_s1, 1024, %s34_s25, [#allocation7], %s748_s13, %s748_s13, %s749_s14  }
  0x15   :  { %s650_s19 = scalar_lea.hbm %s922_s0, 128 }
  0x16   :  { %p651_p8 = scmp.ne.s32.totalorder %s922_s0, %s650_s19  ;;  %p654_p9 = scmp.lt.u32.totalorder %s650_s19, %s922_s0 }
  0x18   :  { %p656_p10 = pnand %p654_p9, %p651_p8 }
  0x1a   :  { %659 = shalt.err (!%p656_p10)
}
  0x1b   :  { %s660_s24 = scalar_lea.vmem %s797_s27, 128  ;;  %p665_p12 = scmp.lt.s32.totalorder %s797_s27, %s797_s27 }
  0x1c   :  { %p661_p11 = scmp.ne.s32.totalorder %s797_s27, %s660_s24  ;;  %p666_p13 = scmp.lt.s32.totalorder %s660_s24, %s660_s24 }
  0x1e   :  { %p667_p0 = por %p666_p13, %p665_p12 }
  0x20   :  { %p668_p1 = pnand %p667_p0, %p661_p11 }
  0x22   :  { %671 = shalt.err (!%p668_p1)
}
  0x23   :  { %27 = dma.hbm_to_vmem [thread:$0]  %s922_s0, 128, %s797_s27, [#allocation4], %s748_s13, %s748_s13, %s749_s14  }
  0x24   :  { %s750_s26 = smov [#allocation8]   ;;  %s751_s29 = smov [#allocation9]  }
  0x25   :  { %s47_s28 = sshll.u32 %s750_s26, 4  ;;  %s61_s30 = sshll.u32 %s751_s29, 4  ;;  %s48_s28 = int_to_ptr.vmem [resolvable:$true] %s47_s28  ;;  %s834_s30 = int_to_ptr.vmem [resolvable:$true] %s61_s30 }
  0x26   :  { %s672_s10 = scalar_lea.hbm %s925_s3, 1024 }
  0x27   :  { %p673_p2 = scmp.ne.s32.totalorder %s925_s3, %s672_s10  ;;  %p676_p3 = scmp.lt.u32.totalorder %s672_s10, %s925_s3 }
  0x29   :  { %p678_p4 = pnand %p676_p3, %p673_p2 }
  0x2b   :  { %681 = shalt.err (!%p678_p4)
}
  0x2c   :  { %s682_s0 = scalar_lea.vmem %s48_s28, 1024  ;;  %p687_p6 = scmp.lt.s32.totalorder %s48_s28, %s48_s28 }
  0x2d   :  { %p683_p5 = scmp.ne.s32.totalorder %s48_s28, %s682_s0  ;;  %p688_p7 = scmp.lt.s32.totalorder %s682_s0, %s682_s0 }
  0x2f   :  { %p689_p8 = por %p688_p7, %p687_p6 }
  0x31   :  { %p690_p9 = pnand %p689_p8, %p683_p5 }
  0x33   :  { %693 = shalt.err (!%p690_p9)
}
  0x34   :  { %53 = dma.hbm_to_vmem [thread:$0]  %s925_s3, 1024, %s48_s28, [#allocation7], %s748_s13, %s748_s13, %s749_s14  }
  0x35   :  { %s694_s20 = scalar_lea.hbm %s927_s5, 1024 }
  0x36   :  { %p695_p10 = scmp.ne.s32.totalorder %s927_s5, %s694_s20  ;;  %p698_p11 = scmp.lt.u32.totalorder %s694_s20, %s927_s5 }
  0x38   :  { %p700_p12 = pnand %p698_p11, %p695_p10 }
  0x3a   :  { %703 = shalt.err (!%p700_p12)
}
  0x3b   :  { %s704_s1 = scalar_lea.vmem %s834_s30, 1024  ;;  %p709_p0 = scmp.lt.s32.totalorder %s834_s30, %s834_s30 }
  0x3c   :  { %p705_p13 = scmp.ne.s32.totalorder %s834_s30, %s704_s1  ;;  %p710_p1 = scmp.lt.s32.totalorder %s704_s1, %s704_s1 }
  0x3e   :  { %p711_p2 = por %p710_p1, %p709_p0 }
  0x40   :  { %p712_p3 = pnand %p711_p2, %p705_p13 }
  0x42   :  { %715 = shalt.err (!%p712_p3)
}
  0x43   :  { %67 = dma.hbm_to_vmem [thread:$0]  %s927_s5, 1024, %s834_s30, [#allocation10], %s748_s13, %s748_s13, %s749_s14  }
  0x44   :  { %738 = dma.done.wait [#allocation4], 128  }
  0x45   :  { %739 = vsyncadd [#allocation4], 4294967168 }
  0x46   :  { %740 = dma.done.wait [#allocation7], 2048  }
  0x47   :  { %741 = vsyncadd [#allocation7], 4294965248 }
  0x48   :  { %742 = dma.done.wait [#allocation10], 1024  }
  0x49   :  { %743 = vsyncadd [#allocation10], 4294966272  ;;  %v752_v0 = vmov 0.0   ;;  %vm753_vm0 = vmmov 0   ;;  %v603_v1 = vld [vmem:[#allocation6] sm:$0xff]   ;;  %v604_v2 = vld [vmem:[#allocation6 + $0x8] sm:$0xff]  }
  0x4a   :  { %532 = vmatprep.subr.bf16.mxu0 %v752_v0  ;;  %548 = vmatprep.mubr.msk.bf16.mxu0 %vm753_vm0, %v752_v0  ;;  %v605_v3 = vld [vmem:[#allocation6 + $0x10] sm:$0xff]   ;;  %v612_v4 = vld [vmem:[#allocation8] sm:$0xff]   ;;  %v606_v5 = vld [vmem:[#allocation6 + $0x18] sm:$0xff]   ;;  %s754_s29 = smov [#allocation11]  }
  0x4b   :  { %552 = vmatprep.subr.bf16.mxu1 %v752_v0  ;;  %568 = vmatprep.mubr.msk.bf16.mxu1 %vm753_vm0, %v752_v0  ;;  %v613_v6 = vld [vmem:[#allocation8 + $0x8] sm:$0xff]   ;;  %v607_v7 = vld [vmem:[#allocation6 + $0x20] sm:$0xff]   ;;  %v614_v8 = vld [vmem:[#allocation8 + $0x10] sm:$0xff]   ;;  %s463_s30 = sshll.u32 %s754_s29, 4  ;;  %s464_s30 = int_to_ptr.vmem [resolvable:$true] %s463_s30 }
  0x4c   :  { %533 = vmatpush3.bf16.msra.mxu0 %v603_v1  ;;  %553 = vmatpush3.bf16.msra.mxu1 %v612_v4  ;;  %v608_v9 = vld [vmem:[#allocation6 + $0x28] sm:$0xff]   ;;  %v615_v10 = vld [vmem:[#allocation8 + $0x18] sm:$0xff]   ;;  %v609_v11 = vld [vmem:[#allocation6 + $0x30] sm:$0xff]   ;;  %p721_p5 = scmp.lt.s32.totalorder %s464_s30, %s464_s30 }
  0x4d   :  { %534 = vmatprep.subr.bf16.mxu0 %v752_v0  ;;  %554 = vmatprep.subr.bf16.mxu1 %v752_v0  ;;  %v616_v12 = vld [vmem:[#allocation8 + $0x20] sm:$0xff]   ;;  %v610_v13 = vld [vmem:[#allocation6 + $0x38] sm:$0xff]   ;;  %v617_v14 = vld [vmem:[#allocation8 + $0x28] sm:$0xff]  }
  0x4e   :  { %v611_v15 = vld [vmem:[#allocation3] sm:$0xff]   ;;  %v618_v16 = vld [vmem:[#allocation8 + $0x30] sm:$0xff]   ;;  %v620_v18 = vld [vmem:[#allocation9] sm:$0xff]  }
  0x4f   :  { %v619_v17 = vld [vmem:[#allocation8 + $0x38] sm:$0xff]   ;;  %v621_v19 = vld [vmem:[#allocation9 + $0x8] sm:$0xff]   ;;  %v622_v20 = vld [vmem:[#allocation9 + $0x10] sm:$0xff]  }
  0x50   :  { %535 = vmatpush3.bf16.msra.mxu0 %v604_v2  ;;  %555 = vmatpush3.bf16.msra.mxu1 %v613_v6  ;;  %v623_v21 = vld [vmem:[#allocation9 + $0x18] sm:$0xff]   ;;  %v624_v22 = vld [vmem:[#allocation9 + $0x20] sm:$0xff]   ;;  %v625_v23 = vld [vmem:[#allocation9 + $0x28] sm:$0xff]  }
  0x51   :  { %536 = vmatprep.subr.bf16.mxu0 %v752_v0  ;;  %556 = vmatprep.subr.bf16.mxu1 %v752_v0  ;;  %v486_v24 = vld [vmem:[%s924_s2] ss:$0 sm:$0xff]  ;;  %v626_v34 = vld [vmem:[#allocation9 + $0x30] sm:$0xff]  }
  0x52   :  { %v627_v35 = vld [vmem:[#allocation9 + $0x38] sm:$0xff]  }
  0x53   :  { %v487_v36 = vld [vmem:[%s926_s4] ss:$0 sm:$0xff]  ;;  %s716_s4 = scalar_lea.vmem %s464_s30, 256 }
  0x54   :  { %537 = vmatpush3.bf16.msra.mxu0 %v605_v3  ;;  %557 = vmatpush3.bf16.msra.mxu1 %v614_v8  ;;  %v496_v46 = vld [vmem:[%s928_s6] ss:$0 sm:$0xff]  ;;  %p717_p4 = scmp.ne.s32.totalorder %s464_s30, %s716_s4  ;;  %p722_p6 = scmp.lt.s32.totalorder %s716_s4, %s716_s4 }
  0x55   :  { %538 = vmatprep.subr.bf16.mxu0 %v752_v0  ;;  %558 = vmatprep.subr.bf16.mxu1 %v752_v0 }
  0x56   :  { %p723_p7 = por %p722_p6, %p721_p5 }
  0x58   :  { %539 = vmatpush3.bf16.msra.mxu0 %v606_v5  ;;  %559 = vmatpush3.bf16.msra.mxu1 %v615_v10  ;;  %p724_p8 = pnand %p723_p7, %p717_p4 }
  0x59   :  { %540 = vmatprep.subr.bf16.mxu0 %v752_v0  ;;  %560 = vmatprep.subr.bf16.mxu1 %v752_v0 }
  0x5c   :  { %541 = vmatpush3.bf16.msra.mxu0 %v607_v7  ;;  %561 = vmatpush3.bf16.msra.mxu1 %v616_v12 }
  0x5d   :  { %542 = vmatprep.subr.bf16.mxu0 %v752_v0  ;;  %562 = vmatprep.subr.bf16.mxu1 %v752_v0 }
  0x60   :  { %543 = vmatpush3.bf16.msra.mxu0 %v608_v9  ;;  %563 = vmatpush3.bf16.msra.mxu1 %v617_v14 }
  0x61   :  { %544 = vmatprep.subr.bf16.mxu0 %v752_v0  ;;  %564 = vmatprep.subr.bf16.mxu1 %v752_v0 }
  0x64   :  { %545 = vmatpush3.bf16.msra.mxu0 %v609_v11  ;;  %565 = vmatpush3.bf16.msra.mxu1 %v618_v16 }
  0x65   :  { %546 = vmatprep.subr.bf16.mxu0 %v752_v0  ;;  %566 = vmatprep.subr.bf16.mxu1 %v752_v0 }
  0x68   :  { %547 = vmatpush3.bf16.msra.mxu0 %v610_v13  ;;  %567 = vmatpush3.bf16.msra.mxu1 %v619_v17 }
  0x69   :  { %572 = vmatprep.subr.bf16.mxu0 %v752_v0 }
  0x6b   :  { %549 = vmatmul.mubr.bf16.vlgmr.msra.gmra.mrb[0].mxu0 %v611_v15 }
  0x6c   :  { %588 = vmatprep.mubr.msk.bf16.mxu0 %vm753_vm0, %v752_v0  ;;  %573 = vmatpush3.bf16.msra.mxu0 %v620_v18 }
  0x6d   :  { %574 = vmatprep.subr.bf16.mxu0 %v752_v0 }
  0x70   :  { %575 = vmatpush3.bf16.msra.mxu0 %v621_v19 }
  0x71   :  { %576 = vmatprep.subr.bf16.mxu0 %v752_v0 }
  0x74   :  { %577 = vmatpush3.bf16.msra.mxu0 %v622_v20 }
  0x75   :  { %578 = vmatprep.subr.bf16.mxu0 %v752_v0 }
  0x78   :  { %579 = vmatpush3.bf16.msra.mxu0 %v623_v21 }
  0x79   :  { %580 = vmatprep.subr.bf16.mxu0 %v752_v0 }
  0x7c   :  { %581 = vmatpush3.bf16.msra.mxu0 %v624_v22 }
  0x7d   :  { %582 = vmatprep.subr.bf16.mxu0 %v752_v0 }
  0x80   :  { %583 = vmatpush3.bf16.msra.mxu0 %v625_v23 }
  0x81   :  { %584 = vmatprep.subr.bf16.mxu0 %v752_v0 }
  0x84   :  { %585 = vmatpush3.bf16.msra.mxu0 %v626_v34 }
  0x85   :  { %586 = vmatprep.subr.bf16.mxu0 %v752_v0 }
  0x88   :  { %587 = vmatpush3.bf16.msra.mxu0 %v627_v35 }
 0x13e   :  { %v189_v25 = vpop.f32.mrb[0].mxu0 }
 0x13f   :  { %v224_v26 = vadd.f32 %v486_v24, %v189_v25  ;;  %v550_v27 = vpop.f32.mrb[1].mxu0 }
 0x140   :  { %v192_v28 = vpop.f32.mrb[2].mxu0 }
 0x141   :  { %v225_v29 = vadd.f32 %v486_v24, %v192_v28  ;;  %v551_v30 = vpop.f32.mrb[3].mxu0  ;;  %v226_v31 = vmax.f32 %v224_v26, 0.0 }
 0x143   :  { %v227_v32 = vmax.f32 %v225_v29, 0.0 }
 0x145   :  { %v228_v33 = vpack.c.bf16 %v227_v32, %v226_v31 }
 0x147   :  { %569 = vmatmul.mubr.bf16.vlgmr.msra.gmra.mrb[0].mxu1 %v228_v33 }
 0x21a   :  { %v334_v37 = vpop.f32.mrb[0].mxu1 }
 0x21b   :  { %v335_v38 = vadd.f32 %v487_v36, %v334_v37  ;;  %v570_v39 = vpop.f32.mrb[1].mxu1 }
 0x21c   :  { %v337_v40 = vpop.f32.mrb[2].mxu1 }
 0x21d   :  { %v338_v41 = vadd.f32 %v487_v36, %v337_v40  ;;  %v571_v42 = vpop.f32.mrb[3].mxu1  ;;  %v341_v43 = vmax.f32 %v335_v38, 0.0 }
 0x21f   :  { %v342_v44 = vmax.f32 %v338_v41, 0.0 }
 0x221   :  { %v343_v45 = vpack.c.bf16 %v342_v44, %v341_v43 }
 0x223   :  { %589 = vmatmul.mubr.bf16.vlgmr.msra.gmra.mrb[4].mxu0 %v343_v45 }
 0x2f6   :  { %v449_v47 = vpop.f32.mrb[4].mxu0 }
 0x2f7   :  { %v450_v48 = vadd.f32 %v496_v46, %v449_v47  ;;  %v590_v49 = vpop.f32.mrb[5].mxu0 }
 0x2f8   :  { %v452_v50 = vpop.f32.mrb[6].mxu0 }
 0x2f9   :  { %456 = vst [vmem:[#allocation11] sm:$0xff] %v450_v48  ;;  %v453_v51 = vadd.f32 %v496_v46, %v452_v50  ;;  %v591_v52 = vpop.f32.mrb[7].mxu0 }
 0x2fb   :  { %457 = vst [vmem:[#allocation11 + $0x8] sm:$0xff] %v453_v51 }
 0x2fc   :  { %727 = shalt.err (!%p724_p8)
}
 0x2fd   :  { %s728_s9 = scalar_lea.hbm %s929_s7, 256 }
 0x2fe   :  { %p729_p9 = scmp.ne.s32.totalorder %s929_s7, %s728_s9  ;;  %p732_p10 = scmp.lt.u32.totalorder %s728_s9, %s929_s7 }
 0x300   :  { %p734_p11 = pnand %p732_p10, %p729_p9 }
 0x302   :  { %737 = shalt.err (!%p734_p11)
}
 0x303   :  { %s755_s16 = smov 128   ;;  %s756_s0 = smov 8  }
 0x304   :  { %469 = dma.vmem_to_hbm [thread:$0]  %s464_s30, 256, %s929_s7, [#allocation5], %s755_s16, %s755_s16, %s756_s0  }
 0x305   :  { %744 = dma.done.wait [#allocation5], 256  }
 0x306   :  { %745 = vsyncadd [#allocation5], 4294967040 }
 0x307   :  { %473 = vsyncpa [#allocation4], 1 }
 0x308   :  { %474 = vsyncpa [#allocation7], 1 }
 0x309   :  { %475 = vsyncpa [#allocation10], 1 }
 0x30a   :  { %476 = vsyncpa [#allocation5], 1 }

// kernel: tpu_custom_call.1
= control target key start
LH: loop header
LB: loop body
LE: loop exit
PB: predicated region body
PF: predicated region fallthrough
CT: control target
= control target key end

     0   :  { %12 = vsyncpa [#allocation4], 0  ;;  %s922_s0 = inlined_call_operand.hbm [shape: bf16[16,128], index: 0, kind: input, shape index: {}]   ;;  %s923_s1 = inlined_call_operand.hbm [shape: bf16[128,128], index: 1, kind: input, shape index: {}]   ;;  %s924_s2 = inlined_call_operand.vmem [shape: f32[1,128], index: 2, kind: input, shape index: {}]   ;;  %s925_s3 = inlined_call_operand.hbm [shape: bf16[128,128], index: 3, kind: input, shape index: {}]   ;;  %s926_s4 = inlined_call_operand.vmem [shape: f32[1,128], index: 4, kind: input, shape index: {}]   ;;  %s927_s5 = inlined_call_operand.hbm [shape: bf16[128,128], index: 5, kind: input, shape index: {}]   ;;  %s928_s6 = inlined_call_operand.vmem [shape: f32[1,128], index: 6, kind: input, shape index: {}]   ;;  %s929_s7 = inlined_call_operand.hbm [shape: f32[16,128], index: 7, kind: output, shape index: {}]  }
   0x1   :  { %13 = vsyncpa [#allocation7], 0 }
   0x2   :  { %14 = vsyncpa [#allocation10], 0 }
   0x3   :  { %15 = vsyncpa [#allocation5], 0  ;;  %s746_s24 = smov [#allocation6]   ;;  %s747_s26 = smov [#allocation3]  }
   0x4   :  { %s33_s25 = sshll.u32 %s746_s24, 4  ;;  %s21_s27 = sshll.u32 %s747_s26, 4  ;;  %s34_s25 = int_to_ptr.vmem [resolvable:$true] %s33_s25  ;;  %s797_s27 = int_to_ptr.vmem [resolvable:$true] %s21_s27 }
   0x5   :  { %s628_s30 = scalar_lea.hbm %s923_s1, 1024 }
   0x6   :  { %p629_p0 = scmp.ne.s32.totalorder %s923_s1, %s628_s30  ;;  %p632_p1 = scmp.lt.u32.totalorder %s628_s30, %s923_s1 }
   0x8   :  { %p634_p2 = pnand %p632_p1, %p629_p0 }
   0xa   :  { %637 = shalt.err (!%p634_p2)
}
   0xb   :  { %s638_s12 = scalar_lea.vmem %s34_s25, 1024  ;;  %p643_p4 = scmp.lt.s32.totalorder %s34_s25, %s34_s25 }
   0xc   :  { %p639_p3 = scmp.ne.s32.totalorder %s34_s25, %s638_s12  ;;  %p644_p5 = scmp.lt.s32.totalorder %s638_s12, %s638_s12 }
   0xe   :  { %p645_p6 = por %p644_p5, %p643_p4 }
  0x10   :  { %p646_p7 = pnand %p645_p6, %p639_p3 }
  0x12   :  { %649 = shalt.err (!%p646_p7)
}
  0x13   :  { %s748_s13 = smov 64   ;;  %s749_s14 = smov 4  }
  0x14   :  { %39 = dma.hbm_to_vmem [thread:$0]  %s923_s1, 1024, %s34_s25, [#allocation7], %s748_s13, %s748_s13, %s749_s14  }
  0x15   :  { %s650_s19 = scalar_lea.hbm %s922_s0, 128 }
  0x16   :  { %p651_p8 = scmp.ne.s32.totalorder %s922_s0, %s650_s19  ;;  %p654_p9 = scmp.lt.u32.totalorder %s650_s19, %s922_s0 }
  0x18   :  { %p656_p10 = pnand %p654_p9, %p651_p8 }
  0x1a   :  { %659 = shalt.err (!%p656_p10)
}
  0x1b   :  { %s660_s24 = scalar_lea.vmem %s797_s27, 128  ;;  %p665_p12 = scmp.lt.s32.totalorder %s797_s27, %s797_s27 }
  0x1c   :  { %p661_p11 = scmp.ne.s32.totalorder %s797_s27, %s660_s24  ;;  %p666_p13 = scmp.lt.s32.totalorder %s660_s24, %s660_s24 }
  0x1e   :  { %p667_p0 = por %p666_p13, %p665_p12 }
  0x20   :  { %p668_p1 = pnand %p667_p0, %p661_p11 }
  0x22   :  { %671 = shalt.err (!%p668_p1)
}
  0x23   :  { %27 = dma.hbm_to_vmem [thread:$0]  %s922_s0, 128, %s797_s27, [#allocation4], %s748_s13, %s748_s13, %s749_s14  }
  0x24   :  { %s750_s26 = smov [#allocation8]   ;;  %s751_s29 = smov [#allocation9]  }
  0x25   :  { %s47_s28 = sshll.u32 %s750_s26, 4  ;;  %s61_s30 = sshll.u32 %s751_s29, 4  ;;  %s48_s28 = int_to_ptr.vmem [resolvable:$true] %s47_s28  ;;  %s834_s30 = int_to_ptr.vmem [resolvable:$true] %s61_s30 }
  0x26   :  { %s672_s10 = scalar_lea.hbm %s925_s3, 1024 }
  0x27   :  { %p673_p2 = scmp.ne.s32.totalorder %s925_s3, %s672_s10  ;;  %p676_p3 = scmp.lt.u32.totalorder %s672_s10, %s925_s3 }
  0x29   :  { %p678_p4 = pnand %p676_p3, %p673_p2 }
  0x2b   :  { %681 = shalt.err (!%p678_p4)
}
  0x2c   :  { %s682_s0 = scalar_lea.vmem %s48_s28, 1024  ;;  %p687_p6 = scmp.lt.s32.totalorder %s48_s28, %s48_s28 }
  0x2d   :  { %p683_p5 = scmp.ne.s32.totalorder %s48_s28, %s682_s0  ;;  %p688_p7 = scmp.lt.s32.totalorder %s682_s0, %s682_s0 }
  0x2f   :  { %p689_p8 = por %p688_p7, %p687_p6 }
  0x31   :  { %p690_p9 = pnand %p689_p8, %p683_p5 }
  0x33   :  { %693 = shalt.err (!%p690_p9)
}
  0x34   :  { %53 = dma.hbm_to_vmem [thread:$0]  %s925_s3, 1024, %s48_s28, [#allocation7], %s748_s13, %s748_s13, %s749_s14  }
  0x35   :  { %s694_s20 = scalar_lea.hbm %s927_s5, 1024 }
  0x36   :  { %p695_p10 = scmp.ne.s32.totalorder %s927_s5, %s694_s20  ;;  %p698_p11 = scmp.lt.u32.totalorder %s694_s20, %s927_s5 }
  0x38   :  { %p700_p12 = pnand %p698_p11, %p695_p10 }
  0x3a   :  { %703 = shalt.err (!%p700_p12)
}
  0x3b   :  { %s704_s1 = scalar_lea.vmem %s834_s30, 1024  ;;  %p709_p0 = scmp.lt.s32.totalorder %s834_s30, %s834_s30 }
  0x3c   :  { %p705_p13 = scmp.ne.s32.totalorder %s834_s30, %s704_s1  ;;  %p710_p1 = scmp.lt.s32.totalorder %s704_s1, %s704_s1 }
  0x3e   :  { %p711_p2 = por %p710_p1, %p709_p0 }
  0x40   :  { %p712_p3 = pnand %p711_p2, %p705_p13 }
  0x42   :  { %715 = shalt.err (!%p712_p3)
}
  0x43   :  { %67 = dma.hbm_to_vmem [thread:$0]  %s927_s5, 1024, %s834_s30, [#allocation10], %s748_s13, %s748_s13, %s749_s14  }
  0x44   :  { %738 = dma.done.wait [#allocation4], 128  }
  0x45   :  { %739 = vsyncadd [#allocation4], 4294967168 }
  0x46   :  { %740 = dma.done.wait [#allocation7], 2048  }
  0x47   :  { %741 = vsyncadd [#allocation7], 4294965248 }
  0x48   :  { %742 = dma.done.wait [#allocation10], 1024  }
  0x49   :  { %743 = vsyncadd [#allocation10], 4294966272  ;;  %v752_v0 = vmov 0.0   ;;  %vm753_vm0 = vmmov 0   ;;  %v603_v1 = vld [vmem:[#allocation6] sm:$0xff]   ;;  %v604_v2 = vld [vmem:[#allocation6 + $0x8] sm:$0xff]  }
  0x4a   :  { %532 = vmatprep.subr.bf16.mxu0 %v752_v0  ;;  %548 = vmatprep.mubr.msk.bf16.mxu0 %vm753_vm0, %v752_v0  ;;  %v605_v3 = vld [vmem:[#allocation6 + $0x10] sm:$0xff]   ;;  %v612_v4 = vld [vmem:[#allocation8] sm:$0xff]   ;;  %v606_v5 = vld [vmem:[#allocation6 + $0x18] sm:$0xff]   ;;  %s754_s29 = smov [#allocation11]  }
  0x4b   :  { %552 = vmatprep.subr.bf16.mxu1 %v752_v0  ;;  %568 = vmatprep.mubr.msk.bf16.mxu1 %vm753_vm0, %v752_v0  ;;  %v613_v6 = vld [vmem:[#allocation8 + $0x8] sm:$0xff]   ;;  %v607_v7 = vld [vmem:[#allocation6 + $0x20] sm:$0xff]   ;;  %v614_v8 = vld [vmem:[#allocation8 + $0x10] sm:$0xff]   ;;  %s463_s30 = sshll.u32 %s754_s29, 4  ;;  %s464_s30 = int_to_ptr.vmem [resolvable:$true] %s463_s30 }
  0x4c   :  { %533 = vmatpush3.bf16.msra.mxu0 %v603_v1  ;;  %553 = vmatpush3.bf16.msra.mxu1 %v612_v4  ;;  %v608_v9 = vld [vmem:[#allocation6 + $0x28] sm:$0xff]   ;;  %v615_v10 = vld [vmem:[#allocation8 + $0x18] sm:$0xff]   ;;  %v609_v11 = vld [vmem:[#allocation6 + $0x30] sm:$0xff]   ;;  %p721_p5 = scmp.lt.s32.totalorder %s464_s30, %s464_s30 }
  0x4d   :  { %534 = vmatprep.subr.bf16.mxu0 %v752_v0  ;;  %554 = vmatprep.subr.bf16.mxu1 %v752_v0  ;;  %v616_v12 = vld [vmem:[#allocation8 + $0x20] sm:$0xff]   ;;  %v610_v13 = vld [vmem:[#allocation6 + $0x38] sm:$0xff]   ;;  %v617_v14 = vld [vmem:[#allocation8 + $0x28] sm:$0xff]  }
  0x4e   :  { %v611_v15 = vld [vmem:[#allocation3] sm:$0xff]   ;;  %v618_v16 = vld [vmem:[#allocation8 + $0x30] sm:$0xff]   ;;  %v620_v18 = vld [vmem:[#allocation9] sm:$0xff]  }
  0x4f   :  { %v619_v17 = vld [vmem:[#allocation8 + $0x38] sm:$0xff]   ;;  %v621_v19 = vld [vmem:[#allocation9 + $0x8] sm:$0xff]   ;;  %v622_v20 = vld [vmem:[#allocation9 + $0x10] sm:$0xff]  }
  0x50   :  { %535 = vmatpush3.bf16.msra.mxu0 %v604_v2  ;;  %555 = vmatpush3.bf16.msra.mxu1 %v613_v6  ;;  %v623_v21 = vld [vmem:[#allocation9 + $0x18] sm:$0xff]   ;;  %v624_v22 = vld [vmem:[#allocation9 + $0x20] sm:$0xff]   ;;  %v625_v23 = vld [vmem:[#allocation9 + $0x28] sm:$0xff]  }
  0x51   :  { %536 = vmatprep.subr.bf16.mxu0 %v752_v0  ;;  %556 = vmatprep.subr.bf16.mxu1 %v752_v0  ;;  %v486_v24 = vld [vmem:[%s924_s2] ss:$0 sm:$0xff]  ;;  %v626_v34 = vld [vmem:[#allocation9 + $0x30] sm:$0xff]  }
  0x52   :  { %v627_v35 = vld [vmem:[#allocation9 + $0x38] sm:$0xff]  }
  0x53   :  { %v487_v36 = vld [vmem:[%s926_s4] ss:$0 sm:$0xff]  ;;  %s716_s4 = scalar_lea.vmem %s464_s30, 256 }
  0x54   :  { %537 = vmatpush3.bf16.msra.mxu0 %v605_v3  ;;  %557 = vmatpush3.bf16.msra.mxu1 %v614_v8  ;;  %v496_v46 = vld [vmem:[%s928_s6] ss:$0 sm:$0xff]  ;;  %p717_p4 = scmp.ne.s32.totalorder %s464_s30, %s716_s4  ;;  %p722_p6 = scmp.lt.s32.totalorder %s716_s4, %s716_s4 }
  0x55   :  { %538 = vmatprep.subr.bf16.mxu0 %v752_v0  ;;  %558 = vmatprep.subr.bf16.mxu1 %v752_v0 }
  0x56   :  { %p723_p7 = por %p722_p6, %p721_p5 }
  0x58   :  { %539 = vmatpush3.bf16.msra.mxu0 %v606_v5  ;;  %559 = vmatpush3.bf16.msra.mxu1 %v615_v10  ;;  %p724_p8 = pnand %p723_p7, %p717_p4 }
  0x59   :  { %540 = vmatprep.subr.bf16.mxu0 %v752_v0  ;;  %560 = vmatprep.subr.bf16.mxu1 %v752_v0 }
  0x5c   :  { %541 = vmatpush3.bf16.msra.mxu0 %v607_v7  ;;  %561 = vmatpush3.bf16.msra.mxu1 %v616_v12 }
  0x5d   :  { %542 = vmatprep.subr.bf16.mxu0 %v752_v0  ;;  %562 = vmatprep.subr.bf16.mxu1 %v752_v0 }
  0x60   :  { %543 = vmatpush3.bf16.msra.mxu0 %v608_v9  ;;  %563 = vmatpush3.bf16.msra.mxu1 %v617_v14 }
  0x61   :  { %544 = vmatprep.subr.bf16.mxu0 %v752_v0  ;;  %564 = vmatprep.subr.bf16.mxu1 %v752_v0 }
  0x64   :  { %545 = vmatpush3.bf16.msra.mxu0 %v609_v11  ;;  %565 = vmatpush3.bf16.msra.mxu1 %v618_v16 }
  0x65   :  { %546 = vmatprep.subr.bf16.mxu0 %v752_v0  ;;  %566 = vmatprep.subr.bf16.mxu1 %v752_v0 }
  0x68   :  { %547 = vmatpush3.bf16.msra.mxu0 %v610_v13  ;;  %567 = vmatpush3.bf16.msra.mxu1 %v619_v17 }
  0x69   :  { %572 = vmatprep.subr.bf16.mxu0 %v752_v0 }
  0x6b   :  { %549 = vmatmul.mubr.bf16.vlgmr.msra.gmra.mrb[0].mxu0 %v611_v15 }
  0x6c   :  { %588 = vmatprep.mubr.msk.bf16.mxu0 %vm753_vm0, %v752_v0  ;;  %573 = vmatpush3.bf16.msra.mxu0 %v620_v18 }
  0x6d   :  { %574 = vmatprep.subr.bf16.mxu0 %v752_v0 }
  0x70   :  { %575 = vmatpush3.bf16.msra.mxu0 %v621_v19 }
  0x71   :  { %576 = vmatprep.subr.bf16.mxu0 %v752_v0 }
  0x74   :  { %577 = vmatpush3.bf16.msra.mxu0 %v622_v20 }
  0x75   :  { %578 = vmatprep.subr.bf16.mxu0 %v752_v0 }
  0x78   :  { %579 = vmatpush3.bf16.msra.mxu0 %v623_v21 }
  0x79   :  { %580 = vmatprep.subr.bf16.mxu0 %v752_v0 }
  0x7c   :  { %581 = vmatpush3.bf16.msra.mxu0 %v624_v22 }
  0x7d   :  { %582 = vmatprep.subr.bf16.mxu0 %v752_v0 }
  0x80   :  { %583 = vmatpush3.bf16.msra.mxu0 %v625_v23 }
  0x81   :  { %584 = vmatprep.subr.bf16.mxu0 %v752_v0 }
  0x84   :  { %585 = vmatpush3.bf16.msra.mxu0 %v626_v34 }
  0x85   :  { %586 = vmatprep.subr.bf16.mxu0 %v752_v0 }
  0x88   :  { %587 = vmatpush3.bf16.msra.mxu0 %v627_v35 }
 0x13e   :  { %v189_v25 = vpop.f32.mrb[0].mxu0 }
 0x13f   :  { %v224_v26 = vadd.f32 %v486_v24, %v189_v25  ;;  %v550_v27 = vpop.f32.mrb[1].mxu0 }
 0x140   :  { %v192_v28 = vpop.f32.mrb[2].mxu0 }
 0x141   :  { %v225_v29 = vadd.f32 %v486_v24, %v192_v28  ;;  %v551_v30 = vpop.f32.mrb[3].mxu0  ;;  %v226_v31 = vmax.f32 %v224_v26, 0.0 }
 0x143   :  { %v227_v32 = vmax.f32 %v225_v29, 0.0 }
 0x145   :  { %v228_v33 = vpack.c.bf16 %v227_v32, %v226_v31 }
 0x147   :  { %569 = vmatmul.mubr.bf16.vlgmr.msra.gmra.mrb[0].mxu1 %v228_v33 }
 0x21a   :  { %v334_v37 = vpop.f32.mrb[0].mxu1 }
 0x21b   :  { %v335_v38 = vadd.f32 %v487_v36, %v334_v37  ;;  %v570_v39 = vpop.f32.mrb[1].mxu1 }
 0x21c   :  { %v337_v40 = vpop.f32.mrb[2].mxu1 }
 0x21d   :  { %v338_v41 = vadd.f32 %v487_v36, %v337_v40  ;;  %v571_v42 = vpop.f32.mrb[3].mxu1  ;;  %v341_v43 = vmax.f32 %v335_v38, 0.0 }
 0x21f   :  { %v342_v44 = vmax.f32 %v338_v41, 0.0 }
 0x221   :  { %v343_v45 = vpack.c.bf16 %v342_v44, %v341_v43 }
 0x223   :  { %589 = vmatmul.mubr.bf16.vlgmr.msra.gmra.mrb[4].mxu0 %v343_v45 }
 0x2f6   :  { %v449_v47 = vpop.f32.mrb[4].mxu0 }
 0x2f7   :  { %v450_v48 = vadd.f32 %v496_v46, %v449_v47  ;;  %v590_v49 = vpop.f32.mrb[5].mxu0 }
 0x2f8   :  { %v452_v50 = vpop.f32.mrb[6].mxu0 }
 0x2f9   :  { %456 = vst [vmem:[#allocation11] sm:$0xff] %v450_v48  ;;  %v453_v51 = vadd.f32 %v496_v46, %v452_v50  ;;  %v591_v52 = vpop.f32.mrb[7].mxu0 }
 0x2fb   :  { %457 = vst [vmem:[#allocation11 + $0x8] sm:$0xff] %v453_v51 }
 0x2fc   :  { %727 = shalt.err (!%p724_p8)
}
 0x2fd   :  { %s728_s9 = scalar_lea.hbm %s929_s7, 256 }
 0x2fe   :  { %p729_p9 = scmp.ne.s32.totalorder %s929_s7, %s728_s9  ;;  %p732_p10 = scmp.lt.u32.totalorder %s728_s9, %s929_s7 }
 0x300   :  { %p734_p11 = pnand %p732_p10, %p729_p9 }
 0x302   :  { %737 = shalt.err (!%p734_p11)
}
 0x303   :  { %s755_s16 = smov 128   ;;  %s756_s0 = smov 8  }
 0x304   :  { %469 = dma.vmem_to_hbm [thread:$0]  %s464_s30, 256, %s929_s7, [#allocation5], %s755_s16, %s755_s16, %s756_s0  }
 0x305   :  { %744 = dma.done.wait [#allocation5], 256  }
 0x306   :  { %745 = vsyncadd [#allocation5], 4294967040 }
 0x307   :  { %473 = vsyncpa [#allocation4], 1 }
 0x308   :  { %474 = vsyncpa [#allocation7], 1 }
 0x309   :  { %475 = vsyncpa [#allocation10], 1 }
 0x30a   :  { %476 = vsyncpa [#allocation5], 1 }

</bundles_post_ra>
